<compile_context>
chip_gen: v5e
topology: v5e:2x2
jax: 0.10.0
libtpu: 0.0.40
codegen_flags: <defaults>
</compile_context>

<pallas_src>
import functools

import jax
import jax.numpy as jnp
from jax.experimental import pallas as pl
from jax.experimental.pallas import tpu as pltpu

HEAD_PAD = 128     # lane-aligned fused head width: [actor logits | critic value | zeros]
MAX_TILE_B = 2048  # rows per grid step; ~6 MiB double-buffered working set (fits v5e/v6e/v7x defaults)


def actor_critic_kernel(x_ref,
                        w_sh_ref, b_sh_ref,      # shared trunk: state_dim -> 64
                        w_ac1_ref, b_ac1_ref,    # fused actor|critic hidden: 64 -> 64
                        w_head_ref, b_head_ref,  # fused block-diagonal head: 64 -> HEAD_PAD
                        probs_ref, value_ref, *, action_dim):
    x = x_ref[...].astype(jnp.float32)

    # shared trunk: ReLU(x @ W_sh + b_sh)
    h = jnp.dot(x, w_sh_ref[...], preferred_element_type=jnp.float32) + b_sh_ref[...]
    h = jnp.maximum(h, 0.0)

    # fused actor/critic hidden layer: one (64, 64) matmul instead of two (64, 32)
    ac = jnp.dot(h, w_ac1_ref[...], preferred_element_type=jnp.float32) + b_ac1_ref[...]
    ac = jnp.maximum(ac, 0.0)

    # fused block-diagonal head: cols [0, action_dim) = actor logits,
    # col action_dim = critic value, remaining cols exactly 0.
    head = jnp.dot(ac, w_head_ref[...], preferred_element_type=jnp.float32) + b_head_ref[...]

    # numerically stable softmax on the narrow logits slice (action_dim is a
    # Python int -> static slice).  Exact division so probs sum to 1.
    logits = head[:, :action_dim]
    m = jnp.max(logits, axis=-1, keepdims=True)
    e = jnp.exp(logits - m)
    denom = jnp.sum(e, axis=-1, keepdims=True)
    probs_ref[...] = (e / denom).astype(probs_ref.dtype)

    # critic value lives in column `action_dim` of the fused head.
    value_ref[...] = head[:, action_dim:action_dim + 1].astype(value_ref.dtype)


def _round_up(x, m):
    return ((x + m - 1) // m) * m


def _choose_tile_b(B):
    """Rows per grid step.

    >= 2 steps whenever B > 8 (so both v7x TensorCores get work), ~>= 8 steps
    with >= 256 rows per step at large B (pipeline overlap vs. per-step
    overhead), capped at MAX_TILE_B to stay inside default scoped VMEM.
    Returned tile is a multiple of 8 (sublane) or equal to B.
    """
    if B <= 8:
        return B
    two_way = _round_up(pl.cdiv(B, 2), 8)
    tile = max(256, _round_up(pl.cdiv(B, 8), 8))
    return min(tile, two_way, MAX_TILE_B)


@functools.partial(jax.jit, static_argnums=(2,))
def actor_critic_forward(x, packed, action_dim):
    """x: (B, state_dim) f32; packed: dict from pack_params.
    Returns (action_probs (B, action_dim), state_value (B, 1))."""
    B, state_dim = x.shape
    tile_b = _choose_tile_b(B)
    grid = (pl.cdiv(B, tile_b),)

    const = lambda i: (0, 0)  # weights/biases: single block, resident across grid steps
    kernel = functools.partial(actor_critic_kernel, action_dim=action_dim)

    probs, value = pl.pallas_call(
        kernel,
        out_shape=(jax.ShapeDtypeStruct((B, action_dim), jnp.float32),
                   jax.ShapeDtypeStruct((B, 1), jnp.float32)),
        grid=grid,
        in_specs=[
            pl.BlockSpec((tile_b, state_dim), lambda i: (i, 0)),
            pl.BlockSpec(packed["w_sh"].shape, const),
            pl.BlockSpec(packed["b_sh"].shape, const),
            pl.BlockSpec(packed["w_ac1"].shape, const),
            pl.BlockSpec(packed["b_ac1"].shape, const),
            pl.BlockSpec(packed["w_head"].shape, const),
            pl.BlockSpec(packed["b_head"].shape, const),
        ],
        out_specs=(pl.BlockSpec((tile_b, action_dim), lambda i: (i, 0)),
                   pl.BlockSpec((tile_b, 1), lambda i: (i, 0))),
        compiler_params=pltpu.CompilerParams(dimension_semantics=("parallel",)),
    )(x, packed["w_sh"], packed["b_sh"], packed["w_ac1"], packed["b_ac1"],
      packed["w_head"], packed["b_head"])
    return probs, value


def init_params(key, state_dim, action_dim):
    """Deterministic init mirroring nn.Linear default U(-1/sqrt(fan_in), +1/sqrt(fan_in))."""
    def linear(key, fan_in, fan_out):
        kw, kb = jax.random.split(key)
        bound = 1.0 / jnp.sqrt(fan_in)
        w = jax.random.uniform(kw, (fan_in, fan_out), jnp.float32, -bound, bound)
        b = jax.random.uniform(kb, (1, fan_out), jnp.float32, -bound, bound)
        return w, b

    keys = jax.random.split(key, 5)
    w_sh, b_sh = linear(keys[0], state_dim, 64)
    w_a1, b_a1 = linear(keys[1], 64, 32)
    w_a2, b_a2 = linear(keys[2], 32, action_dim)
    w_c1, b_c1 = linear(keys[3], 64, 32)
    w_c2, b_c2 = linear(keys[4], 32, 1)
    return dict(w_sh=w_sh, b_sh=b_sh, w_a1=w_a1, b_a1=b_a1, w_a2=w_a2, b_a2=b_a2,
                w_c1=w_c1, b_c1=b_c1, w_c2=w_c2, b_c2=b_c2)


def pack_params(p, action_dim):
    """One-time host-side weight packing for the fused kernel."""
    assert action_dim + 1 <= HEAD_PAD, "fused head needs action_dim logits + 1 value column"
    assert p["w_a1"].shape == (64, 32) and p["w_c1"].shape == (64, 32)
    assert p["w_a2"].shape == (32, action_dim) and p["w_c2"].shape == (32, 1)

    w_ac1 = jnp.concatenate([p["w_a1"], p["w_c1"]], axis=1)   # (64, 64)
    b_ac1 = jnp.concatenate([p["b_a1"], p["b_c1"]], axis=1)   # (1, 64)

    w_head = jnp.zeros((64, HEAD_PAD), jnp.float32)
    w_head = w_head.at[:32, :action_dim].set(p["w_a2"])       # actor head
    w_head = w_head.at[32:, action_dim].set(p["w_c2"][:, 0])  # critic head
    b_head = jnp.zeros((1, HEAD_PAD), jnp.float32)
    b_head = b_head.at[0, :action_dim].set(p["b_a2"][0])
    b_head = b_head.at[0, action_dim].set(p["b_c2"][0, 0])

    return dict(w_sh=p["w_sh"], b_sh=p["b_sh"],
                w_ac1=w_ac1, b_ac1=b_ac1,
                w_head=w_head, b_head=b_head)


def reference_forward(x, p):
    """Pure-JAX reference (unfused weights) for correctness checking."""
    hp = jax.lax.Precision.HIGHEST
    h = jax.nn.relu(jnp.dot(x, p["w_sh"], precision=hp) + p["b_sh"])
    a = jax.nn.relu(jnp.dot(h, p["w_a1"], precision=hp) + p["b_a1"])
    probs = jax.nn.softmax(jnp.dot(a, p["w_a2"], precision=hp) + p["b_a2"], axis=-1)
    c = jax.nn.relu(jnp.dot(h, p["w_c1"], precision=hp) + p["b_c1"])
    value = jnp.dot(c, p["w_c2"], precision=hp) + p["b_c2"]
    return probs, value


if __name__ == "__main__":
    key = jax.random.PRNGKey(0)
    k_x, k_p = jax.random.split(key)

    batch = 2
    state_dim = 16
    action_dim = 4

    x = jax.random.normal(k_x, (batch, state_dim), jnp.float32)
    params = init_params(k_p, state_dim, action_dim)
    packed = pack_params(params, action_dim)

    probs, value = actor_critic_forward(x, packed, action_dim)
    probs = jax.block_until_ready(probs)
    value = jax.block_until_ready(value)

    probs_ref, value_ref = reference_forward(x, params)
    assert probs.shape == (batch, action_dim)
    assert value.shape == (batch, 1)
    assert jnp.allclose(probs, probs_ref, atol=1e-3, rtol=1e-3)
    assert jnp.allclose(value, value_ref, atol=1e-4, rtol=1e-4)
    # exact division in the softmax -> rows sum to 1 to within f32 rounding
    assert jnp.allclose(jnp.sum(probs, axis=-1), 1.0, atol=1e-5)

    print("KERNEL_OK")
</pallas_src>

<mosaic_0001>
module attributes {stable_mosaic.version = 11 : i64} {
  func.func @actor_critic_kernel(%arg0: i32, %arg1: memref<2x16xf32, #tpu.memory_space<vmem>>, %arg2: memref<16x64xf32, #tpu.memory_space<vmem>>, %arg3: memref<1x64xf32, #tpu.memory_space<vmem>>, %arg4: memref<64x64xf32, #tpu.memory_space<vmem>>, %arg5: memref<1x64xf32, #tpu.memory_space<vmem>>, %arg6: memref<64x128xf32, #tpu.memory_space<vmem>>, %arg7: memref<1x128xf32, #tpu.memory_space<vmem>>, %arg8: memref<2x4xf32, #tpu.memory_space<vmem>>, %arg9: memref<2x1xf32, #tpu.memory_space<vmem>>) attributes {dimension_semantics = [#tpu.dimension_semantics<parallel>], iteration_bounds = array<i64: 1>, scalar_prefetch = 0 : i64, scratch_operands = 0 : i64, tpu.core_type = #tpu.core_type<tc>, window_params = [{transform_indices = @transform_0, window_bounds = array<i64: 2, 16>}, {pipeline_mode = #tpu.pipeline_mode<synchronous>, transform_indices = @transform_1, window_bounds = array<i64: 16, 64>}, {pipeline_mode = #tpu.pipeline_mode<synchronous>, transform_indices = @transform_2, window_bounds = array<i64: 1, 64>}, {pipeline_mode = #tpu.pipeline_mode<synchronous>, transform_indices = @transform_3, window_bounds = array<i64: 64, 64>}, {pipeline_mode = #tpu.pipeline_mode<synchronous>, transform_indices = @transform_4, window_bounds = array<i64: 1, 64>}, {pipeline_mode = #tpu.pipeline_mode<synchronous>, transform_indices = @transform_5, window_bounds = array<i64: 64, 128>}, {pipeline_mode = #tpu.pipeline_mode<synchronous>, transform_indices = @transform_6, window_bounds = array<i64: 1, 128>}, {transform_indices = @transform_7, window_bounds = array<i64: 2, 4>}, {transform_indices = @transform_8, window_bounds = array<i64: 2, 1>}]} {
    %c0 = arith.constant 0 : index
    %c0_0 = arith.constant 0 : index
    %0 = vector.load %arg1[%c0, %c0_0] : memref<2x16xf32, #tpu.memory_space<vmem>>, vector<2x16xf32>
    %c0_1 = arith.constant 0 : index
    %c0_2 = arith.constant 0 : index
    %1 = vector.load %arg2[%c0_1, %c0_2] : memref<16x64xf32, #tpu.memory_space<vmem>>, vector<16x64xf32>
    %cst = arith.constant dense<0.000000e+00> : vector<2x64xf32>
    %2 = tpu.matmul %0, %1, %cst {dimension_numbers = #tpu.dot_dimension_numbers<[1], [0], [0], [1], [0, 0, 1, 1], [], []>} : vector<2x16xf32>, vector<16x64xf32>, vector<2x64xf32> -> vector<2x64xf32>
    %c0_3 = arith.constant 0 : index
    %c0_4 = arith.constant 0 : index
    %3 = vector.load %arg3[%c0_3, %c0_4] : memref<1x64xf32, #tpu.memory_space<vmem>>, vector<1x64xf32>
    %4 = vector.broadcast %3 : vector<1x64xf32> to vector<2x64xf32>
    %5 = arith.addf %2, %4 : vector<2x64xf32>
    %cst_5 = arith.constant 0.000000e+00 : f32
    %6 = vector.broadcast %cst_5 : f32 to vector<2x64xf32>
    %7 = arith.maximumf %5, %6 : vector<2x64xf32>
    %c0_6 = arith.constant 0 : index
    %c0_7 = arith.constant 0 : index
    %8 = vector.load %arg4[%c0_6, %c0_7] : memref<64x64xf32, #tpu.memory_space<vmem>>, vector<64x64xf32>
    %cst_8 = arith.constant dense<0.000000e+00> : vector<2x64xf32>
    %9 = tpu.matmul %7, %8, %cst_8 {dimension_numbers = #tpu.dot_dimension_numbers<[1], [0], [0], [1], [0, 0, 1, 1], [], []>} : vector<2x64xf32>, vector<64x64xf32>, vector<2x64xf32> -> vector<2x64xf32>
    %c0_9 = arith.constant 0 : index
    %c0_10 = arith.constant 0 : index
    %10 = vector.load %arg5[%c0_9, %c0_10] : memref<1x64xf32, #tpu.memory_space<vmem>>, vector<1x64xf32>
    %11 = vector.broadcast %10 : vector<1x64xf32> to vector<2x64xf32>
    %12 = arith.addf %9, %11 : vector<2x64xf32>
    %cst_11 = arith.constant 0.000000e+00 : f32
    %13 = vector.broadcast %cst_11 : f32 to vector<2x64xf32>
    %14 = arith.maximumf %12, %13 : vector<2x64xf32>
    %c0_12 = arith.constant 0 : index
    %c0_13 = arith.constant 0 : index
    %15 = vector.load %arg6[%c0_12, %c0_13] : memref<64x128xf32, #tpu.memory_space<vmem>>, vector<64x128xf32>
    %cst_14 = arith.constant dense<0.000000e+00> : vector<2x128xf32>
    %16 = tpu.matmul %14, %15, %cst_14 {dimension_numbers = #tpu.dot_dimension_numbers<[1], [0], [0], [1], [0, 0, 1, 1], [], []>} : vector<2x64xf32>, vector<64x128xf32>, vector<2x128xf32> -> vector<2x128xf32>
    %c0_15 = arith.constant 0 : index
    %c0_16 = arith.constant 0 : index
    %17 = vector.load %arg7[%c0_15, %c0_16] : memref<1x128xf32, #tpu.memory_space<vmem>>, vector<1x128xf32>
    %18 = vector.broadcast %17 : vector<1x128xf32> to vector<2x128xf32>
    %19 = arith.addf %16, %18 : vector<2x128xf32>
    %20 = vector.extract_strided_slice %19 {offsets = [0, 0], sizes = [2, 4], strides = [1, 1]} : vector<2x128xf32> to vector<2x4xf32>
    %cst_17 = arith.constant dense<0xFF800000> : vector<2xf32>
    %21 = vector.multi_reduction <maximumf>, %20, %cst_17 [1] : vector<2x4xf32> to vector<2xf32>
    %22 = vector.shape_cast %21 : vector<2xf32> to vector<2x1xf32>
    %23 = vector.broadcast %22 : vector<2x1xf32> to vector<2x4xf32>
    %24 = arith.subf %20, %23 : vector<2x4xf32>
    %25 = math.exp %24 : vector<2x4xf32>
    %cst_18 = arith.constant dense<0.000000e+00> : vector<2xf32>
    %26 = vector.multi_reduction <add>, %25, %cst_18 [1] : vector<2x4xf32> to vector<2xf32>
    %27 = vector.shape_cast %26 : vector<2xf32> to vector<2x1xf32>
    %28 = vector.broadcast %27 : vector<2x1xf32> to vector<2x4xf32>
    %29 = arith.divf %25, %28 : vector<2x4xf32>
    %c0_19 = arith.constant 0 : index
    %c0_20 = arith.constant 0 : index
    %30 = vector.load %arg8[%c0_19, %c0_20] : memref<2x4xf32, #tpu.memory_space<vmem>>, vector<2x4xf32>
    tpu.vector_store %arg8[%c0_19, %c0_20], %29 {strides = array<i32>} : memref<2x4xf32, #tpu.memory_space<vmem>>, vector<2x4xf32>,
    %31 = vector.extract_strided_slice %19 {offsets = [0, 4], sizes = [2, 1], strides = [1, 1]} : vector<2x128xf32> to vector<2x1xf32>
    %c0_21 = arith.constant 0 : index
    %c0_22 = arith.constant 0 : index
    %32 = vector.load %arg9[%c0_21, %c0_22] : memref<2x1xf32, #tpu.memory_space<vmem>>, vector<2x1xf32>
    tpu.vector_store %arg9[%c0_21, %c0_22], %31 {strides = array<i32>} : memref<2x1xf32, #tpu.memory_space<vmem>>, vector<2x1xf32>,
    return
  }
  func.func @transform_0(%arg0: i32) -> (i32, i32) {
    %c0_i32 = arith.constant 0 : i32
    %c0_i32_0 = arith.constant 0 : i32
    return %arg0, %c0_i32 : i32, i32
  }
  func.func @transform_1(%arg0: i32) -> (i32, i32) {
    %c0_i32 = arith.constant 0 : i32
    %c0_i32_0 = arith.constant 0 : i32
    %c0_i32_1 = arith.constant 0 : i32
    return %c0_i32, %c0_i32_0 : i32, i32
  }
  func.func @transform_2(%arg0: i32) -> (i32, i32) {
    %c0_i32 = arith.constant 0 : i32
    %c0_i32_0 = arith.constant 0 : i32
    %c0_i32_1 = arith.constant 0 : i32
    return %c0_i32, %c0_i32_0 : i32, i32
  }
  func.func @transform_3(%arg0: i32) -> (i32, i32) {
    %c0_i32 = arith.constant 0 : i32
    %c0_i32_0 = arith.constant 0 : i32
    %c0_i32_1 = arith.constant 0 : i32
    return %c0_i32, %c0_i32_0 : i32, i32
  }
  func.func @transform_4(%arg0: i32) -> (i32, i32) {
    %c0_i32 = arith.constant 0 : i32
    %c0_i32_0 = arith.constant 0 : i32
    %c0_i32_1 = arith.constant 0 : i32
    return %c0_i32, %c0_i32_0 : i32, i32
  }
  func.func @transform_5(%arg0: i32) -> (i32, i32) {
    %c0_i32 = arith.constant 0 : i32
    %c0_i32_0 = arith.constant 0 : i32
    %c0_i32_1 = arith.constant 0 : i32
    return %c0_i32, %c0_i32_0 : i32, i32
  }
  func.func @transform_6(%arg0: i32) -> (i32, i32) {
    %c0_i32 = arith.constant 0 : i32
    %c0_i32_0 = arith.constant 0 : i32
    %c0_i32_1 = arith.constant 0 : i32
    return %c0_i32, %c0_i32_0 : i32, i32
  }
  func.func @transform_7(%arg0: i32) -> (i32, i32) {
    %c0_i32 = arith.constant 0 : i32
    %c0_i32_0 = arith.constant 0 : i32
    return %arg0, %c0_i32 : i32, i32
  }
  func.func @transform_8(%arg0: i32) -> (i32, i32) {
    %c0_i32 = arith.constant 0 : i32
    %c0_i32_0 = arith.constant 0 : i32
    return %arg0, %c0_i32 : i32, i32
  }
}

</mosaic_0001>

<bundles_post_ra>
// kernel: actor_critic_forward.1
= control target key start
LH: loop header
LB: loop body
LE: loop exit
PB: predicated region body
PF: predicated region fallthrough
CT: control target
= control target key end

     0   :  { %14 = vsyncpa [#allocation3], 0  ;;  %s569_s0 = inlined_call_operand.hbm [shape: f32[2,16], index: 0, kind: input, shape index: {}]   ;;  %s570_s1 = inlined_call_operand.hbm [shape: f32[16,64], index: 1, kind: input, shape index: {}]   ;;  %s571_s2 = inlined_call_operand.vmem [shape: f32[1,64], index: 2, kind: input, shape index: {}]   ;;  %s572_s3 = inlined_call_operand.hbm [shape: f32[64,64], index: 3, kind: input, shape index: {}]   ;;  %s573_s4 = inlined_call_operand.hbm [shape: f32[1,64], index: 4, kind: input, shape index: {}]   ;;  %s574_s5 = inlined_call_operand.hbm [shape: f32[64,128], index: 5, kind: input, shape index: {}]   ;;  %s575_s6 = inlined_call_operand.hbm [shape: f32[1,128], index: 6, kind: input, shape index: {}]   ;;  %s576_s7 = inlined_call_operand.hbm [shape: f32[2,4], index: 7, kind: output, shape index: {0}]   ;;  %s577_s8 = inlined_call_operand.vmem [shape: f32[2,1], index: 8, kind: output, shape index: {1}]  }
   0x1   :  { %15 = vsyncpa [#allocation6], 0 }
   0x2   :  { %16 = vsyncpa [#allocation9], 0 }
   0x3   :  { %17 = vsyncpa [#allocation12], 0  ;;  %s34_s29 = sshll.u32 %s570_s1, 4  ;;  %s35_s29 = int_to_ptr.hbm [resolvable:$true] %s34_s29 }
   0x4   :  { %18 = vsyncpa [#allocation4], 0  ;;  %s475_s30 = smov [#allocation5]   ;;  %s63_s12 = sshll.u32 %s573_s4, 4  ;;  %s64_s12 = int_to_ptr.hbm [resolvable:$true] %s63_s12 }
   0x5   :  { %s36_s9 = sshll.u32 %s475_s30, 4  ;;  %s476_s13 = smov 128   ;;  %s37_s9 = int_to_ptr.vmem [resolvable:$true] %s36_s9 }
   0x6   :  { %s477_s14 = smov 8   ;;  %s478_s15 = smov [#allocation8]  }
   0x7   :  { %42 = dma.hbm_to_vmem [thread:$0]  %s35_s29, 256, %s37_s9, [#allocation6], %s476_s13, %s476_s13, %s477_s14  }
   0x8   :  { %s65_s16 = sshll.u32 %s478_s15, 4  ;;  %s24_s18 = sshll.u32 %s569_s0, 4  ;;  %s66_s16 = int_to_ptr.vmem [resolvable:$true] %s65_s16  ;;  %s25_s18 = int_to_ptr.hbm [resolvable:$true] %s24_s18 }
   0x9   :  { %68 = dma.hbm_to_vmem [thread:$0]  %s64_s12, 16, %s66_s16, [#allocation9]  }
   0xa   :  { %s49_s4 = sshll.u32 %s572_s3, 4  ;;  %s479_s21 = smov [#allocation2]   ;;  %s50_s4 = int_to_ptr.hbm [resolvable:$true] %s49_s4 }
   0xb   :  { %s26_s22 = sshll.u32 %s479_s21, 4  ;;  %s480_s23 = smov [#allocation7]   ;;  %s27_s22 = int_to_ptr.vmem [resolvable:$true] %s26_s22 }
   0xc   :  { %29 = dma.hbm_to_vmem [thread:$0]  %s25_s18, 32, %s27_s22, [#allocation3]  }
   0xd   :  { %s51_s24 = sshll.u32 %s480_s23, 4  ;;  %s73_s27 = sshll.u32 %s574_s5, 4  ;;  %s52_s24 = int_to_ptr.vmem [resolvable:$true] %s51_s24  ;;  %s74_s27 = int_to_ptr.hbm [resolvable:$true] %s73_s27 }
   0xe   :  { %57 = dma.hbm_to_vmem [thread:$0]  %s50_s4, 1024, %s52_s24, [#allocation6], %s476_s13, %s476_s13, %s477_s14  }
   0xf   :  { %s87_s3 = sshll.u32 %s575_s6, 4  ;;  %s481_s29 = smov [#allocation10]   ;;  %s88_s3 = int_to_ptr.hbm [resolvable:$true] %s87_s3 }
  0x10   :  { %s75_s30 = sshll.u32 %s481_s29, 4  ;;  %s482_s9 = smov [#allocation11]   ;;  %s76_s30 = int_to_ptr.vmem [resolvable:$true] %s75_s30 }
  0x11   :  { %81 = dma.hbm_to_vmem [thread:$0]  %s74_s27, 1024, %s76_s30, [#allocation9], %s476_s13, %s476_s13, %s477_s14  }
  0x12   :  { %s89_s5 = sshll.u32 %s482_s9, 4  ;;  %s90_s5 = int_to_ptr.vmem [resolvable:$true] %s89_s5 }
  0x13   :  { %92 = dma.hbm_to_vmem [thread:$0]  %s88_s3, 16, %s90_s5, [#allocation12]  }
  0x14   :  { %465 = dma.done.wait [#allocation3], 32  }
  0x15   :  { %466 = vsyncadd [#allocation3], 4294967264 }
  0x16   :  { %467 = dma.done.wait [#allocation6], 1280  }
  0x17   :  { %468 = vsyncadd [#allocation6], 4294966016 }
  0x18   :  { %469 = dma.done.wait [#allocation9], 1040  }
  0x19   :  { %470 = vsyncadd [#allocation9], 4294966256 }
  0x1a   :  { %471 = dma.done.wait [#allocation12], 16  }
  0x1b   :  { %472 = vsyncadd [#allocation12], 4294967280  ;;  %v119_v0 = vld [vmem:[#allocation5 + $0x8] sm:$0xff]  ;;  %v118_v1 = vld [vmem:[#allocation5] sm:$0xff]  ;;  %vm124_vm0 = vcmask 130048   ;;  %vm161_vm1 = vcmask 523264  }
  0x1c   :  { %142 = vmatpush.msra.mxu0 %v119_v0  ;;  %v117_v2 = vld [vmem:[#allocation2] sm:$0x3]  ;;  %v156_v3 = vld [vmem:[#allocation7 + $0x38] sm:$0xff]  ;;  %v155_v4 = vld [vmem:[#allocation7 + $0x30] sm:$0xff]  ;;  %vm221_vm2 = vcmask 25600   ;;  %vm251_vm3 = vcmask 1024  }
  0x1d   :  { %173 = vmatpush.msra.mxu1 %v156_v3  ;;  %v154_v5 = vld [vmem:[#allocation7 + $0x28] sm:$0xff]  ;;  %v153_v6 = vld [vmem:[#allocation7 + $0x20] sm:$0xff]  ;;  %v152_v7 = vld [vmem:[#allocation7 + $0x18] sm:$0xff]  ;;  %s260_s16 = sshll.u32 %s576_s7, 4  ;;  %s261_s16 = int_to_ptr.hbm [resolvable:$true] %s260_s16 }
  0x1e   :  { %143 = vmatpush.msra.mxu0 %v118_v1  ;;  %v151_v8 = vld [vmem:[#allocation7 + $0x10] sm:$0xff]  ;;  %v150_v9 = vld [vmem:[#allocation7 + $0x8] sm:$0xff]  ;;  %v149_v10 = vld [vmem:[#allocation7] sm:$0xff] }
  0x1f   :  { %277 = vmatmul.msk.f32.vlgmr.msra.gmra.mxu0 %vm124_vm0, %v117_v2  ;;  %174 = vmatpush.msra.mxu1 %v155_v4  ;;  %v193_v11 = vld [vmem:[#allocation10 + $0x38] sm:$0xff]  ;;  %v192_v12 = vld [vmem:[#allocation10 + $0x30] sm:$0xff]  ;;  %v191_v13 = vld [vmem:[#allocation10 + $0x28] sm:$0xff] }
  0x20   :  { %209 = vmatpush.msra.mxu2 %v193_v11  ;;  %v190_v14 = vld [vmem:[#allocation10 + $0x20] sm:$0xff]  ;;  %v189_v15 = vld [vmem:[#allocation10 + $0x18] sm:$0xff]  ;;  %v290_v16 = vld [vmem:[%s571_s2] ss:$0 sm:$0xff]  ;;  %s483_s2 = smov 124  }
  0x21   :  { %175 = vmatpush.msra.mxu1 %v154_v5  ;;  %v188_v20 = vld [vmem:[#allocation10 + $0x10] sm:$0xff]  ;;  %v187_v21 = vld [vmem:[#allocation10 + $0x8] sm:$0xff]  ;;  %v186_v22 = vld [vmem:[#allocation10] sm:$0xff] }
  0x22   :  { %210 = vmatpush.msra.mxu2 %v192_v12  ;;  %v291_v23 = vld [vmem:[#allocation8] ss:$0 sm:$0xff]  ;;  %v292_v27 = vld [vmem:[#allocation11] ss:$0 sm:$0xff] }
  0x23   :  { %176 = vmatpush.msra.mxu1 %v153_v6 }
  0x24   :  { %211 = vmatpush.msra.mxu2 %v191_v13 }
  0x25   :  { %177 = vmatpush.msra.mxu1 %v152_v7 }
  0x26   :  { %212 = vmatpush.msra.mxu2 %v190_v14 }
  0x27   :  { %178 = vmatpush.msra.mxu1 %v151_v8 }
  0x28   :  { %213 = vmatpush.msra.mxu2 %v189_v15 }
  0x29   :  { %179 = vmatpush.msra.mxu1 %v150_v9 }
  0x2a   :  { %214 = vmatpush.msra.mxu2 %v188_v20 }
  0x2b   :  { %180 = vmatpush.msra.mxu1 %v149_v10 }
  0x2c   :  { %215 = vmatpush.msra.mxu2 %v187_v21 }
  0x2e   :  { %216 = vmatpush.msra.mxu2 %v186_v22 }
  0x9c   :  { %v145_v17 = vpop.f32.mrf.mxu0 }
  0x9d   :  { %v146_v18 = vadd.f32 %v290_v16, %v145_v17 }
  0x9f   :  { %v148_v19 = vmax.f32 %v146_v18, 0.0 }
  0xa1   :  { %278 = vmatmul.msk.f32.vlgmr.msra.gmra.mxu1 %vm161_vm1, %v148_v19 }
 0x11e   :  { %v182_v24 = vpop.f32.mrf.mxu1 }
 0x11f   :  { %v183_v25 = vadd.f32 %v291_v23, %v182_v24 }
 0x121   :  { %v185_v26 = vmax.f32 %v183_v25, 0.0 }
 0x123   :  { %279 = vmatmul.msk.f32.vlgmr.msra.gmra.mxu2 %vm161_vm1, %v185_v26 }
 0x1a6   :  { %v218_v28 = vpop.f32.mrf.mxu2 }
 0x1a7   :  { %v219_v29 = vadd.f32 %v292_v27, %v218_v28 }
 0x1a9   :  { %248 = vrot.lane.b32.xlu1 %v219_v29, %s483_s2  ;;  %v222_v30 = vsel %vm221_vm2, %v219_v29, -inf }
 0x1aa   :  { %223 = vmax.xlane.f32.xlu0 %v222_v30 }
 0x21b   :  { %v249_v31 = vpop.permute.xlu1 %248 }
 0x21c   :  { %252 = vst.msk [vmem:[%s577_s8] sm:$0x3] %vm251_vm3, %v249_v31  ;;  %s484_s8 = smov [#allocation13]  }
 0x21d   :  { %v224_v32 = vpop.xlane.xlu0 %223  ;;  %s258_s13 = sshll.u32 %s484_s8, 4  ;;  %s259_s13 = int_to_ptr.vmem [resolvable:$true] %s258_s13 }
 0x21e   :  { %v225_v33 = vsub.f32 %v219_v29, %v224_v32 }
 0x220   :  { %v226_v34 = vmul.f32 1.442695, %v225_v33 }
 0x222   :  { %293 = vpow2.f32 %v226_v34 }
 0x228   :  { %v294_v35 = vpop.eup %293 }
 0x229   :  { %v228_v36 = vsel %vm221_vm2, %v294_v35, 0.0 }
 0x22a   :  { %229 = vadd.xlane.f32.xlu0 %v228_v36 }
 0x29d   :  { %v230_v37 = vpop.xlane.xlu0 %229 }
 0x29e   :  { %295 = vrcp.f32 %v230_v37  ;;  %v242_v41 = vand.u32 2147483648, %v230_v37  ;;  %v240_v43 = vand.u32 2147483647, %v230_v37  ;;  %vm236_vm5 = vweird.f32 %v230_v37 }
 0x2a0   :  { %v243_v45 = vor.u32 1.1754944e-38, %v242_v41  ;;  %vm241_vm7 = vcmp.eq.f32.partialorder %v240_v43, 8.507059e+37 }
 0x2a4   :  { %v296_v38 = vpop.eup %295 }
 0x2a5   :  { %v232_v39 = vmul.f32 %v296_v38, %v230_v37  ;;  %vm237_vm4 = vweird.f32 %v296_v38 }
 0x2a6   :  { %vm238_vm6 = vmor %vm236_vm5, %vm237_vm4 }
 0x2a7   :  { %v233_v40 = vsub.f32 1.0, %v232_v39 }
 0x2a9   :  { %v234_v42 = vmul.f32 %v296_v38, %v233_v40 }
 0x2ab   :  { %v235_v44 = vadd.f32 %v296_v38, %v234_v42 }
 0x2ad   :  { %v239_v46 = vsel %vm238_vm6, %v296_v38, %v235_v44 }
 0x2ae   :  { %v244_v47 = vsel %vm241_vm7, %v243_v45, %v239_v46 }
 0x2af   :  { %v245_v48 = vmul.f32 %v294_v35, %v244_v47 }
 0x2b1   :  { %246 = vst.msk [vmem:[#allocation13] sm:$0x3] %vm221_vm2, %v245_v48 }
 0x2b2   :  { %263 = dma.vmem_to_hbm [thread:$0]  %s259_s13, 32, %s261_s16, [#allocation4]  }
 0x2b3   :  { %473 = dma.done.wait [#allocation4], 32  }
 0x2b4   :  { %474 = vsyncadd [#allocation4], 4294967264 }
 0x2b5   :  { %272 = vsyncpa [#allocation3], 1 }
 0x2b6   :  { %273 = vsyncpa [#allocation6], 1 }
 0x2b7   :  { %274 = vsyncpa [#allocation9], 1 }
 0x2b8   :  { %275 = vsyncpa [#allocation12], 1 }
 0x2b9   :  { %276 = vsyncpa [#allocation4], 1 }

</bundles_post_ra>
